<compile_context>
chip_gen: v6e
topology: v6e:2x2x1
jax: 0.10.0
libtpu: 0.0.40
codegen_flags: <defaults>
</compile_context>

<pallas_src>
import jax
import jax.numpy as jnp
from jax.experimental import pallas as pl
from jax.experimental.pallas import tpu as pltpu


def _round_up(n, m):
    return ((n + m - 1) // m) * m


def make_mlp_kernel(num_layers, obs_pad, act_size, pad):
    """Fused (Linear + ReLU) * num_layers followed by LogSoftmax(dim=1) over the
    first `act_size` valid lanes of the padded feature dimension."""

    def kernel(x_ref, w_ref, b_ref, o_ref):
        # ---- layer 0: K = obs_pad (input kept at its natural lane width) ----
        h = jnp.dot(x_ref[...].astype(jnp.bfloat16),
                    w_ref[0, :obs_pad, :],
                    preferred_element_type=jnp.float32) + b_ref[0]
        h = jnp.maximum(h, 0.0)                       # ReLU in f32

        # ---- remaining layers: full (pad x pad) padded matmuls ----
        for i in range(1, num_layers):
            h = jnp.dot(h.astype(jnp.bfloat16), w_ref[i],
                        preferred_element_type=jnp.float32) + b_ref[i]
            h = jnp.maximum(h, 0.0)

        # ---- LogSoftmax along dim=1 over the act_size valid lanes ----
        col = jax.lax.broadcasted_iota(jnp.int32, (1, pad), 1)   # 1 vreg mask
        valid = col < act_size
        logits = jnp.where(valid, h, jnp.float32(-1e30))
        m = jnp.max(logits, axis=1, keepdims=True)
        lse = m + jnp.log(jnp.sum(jnp.exp(logits - m), axis=1, keepdims=True))
        # Valid lanes of `logits` equal `h`; only the valid lanes are stored.
        o_ref[...] = (h - lse)[:, :act_size].astype(o_ref.dtype)

    return kernel


def init_params(key, linear_num, hidden_size, obs_size, act_size, dtype=jnp.float32):
    """PyTorch-style Linear init: U(-1/sqrt(fan_in), 1/sqrt(fan_in)).
    Returns a flat list [w0, b0, w1, b1, ...] with W stored as (in, out)."""
    dims = [obs_size] + [hidden_size] * (linear_num + 1) + [act_size]
    params = []
    for fan_in, fan_out in zip(dims[:-1], dims[1:]):
        key, kw, kb = jax.random.split(key, 3)
        bound = 1.0 / jnp.sqrt(jnp.asarray(fan_in, dtype))
        w = jax.random.uniform(kw, (fan_in, fan_out), dtype, -bound, bound)
        b = jax.random.uniform(kb, (1, fan_out), dtype, -bound, bound)
        params += [w, b]
    return params


def pack_params(params, pad, w_dtype=jnp.bfloat16):
    """Zero-pad every layer's W to (pad, pad) (bf16 for the MXU) and b to
    (1, pad) (f32), stacked along a leading layer axis.  Zero padding is exact:
    padded rows/cols contribute nothing to the real outputs."""
    num_layers = len(params) // 2
    w_packed = jnp.zeros((num_layers, pad, pad), w_dtype)
    b_packed = jnp.zeros((num_layers, 1, pad), jnp.float32)
    for i in range(num_layers):
        w = params[2 * i].astype(w_dtype)
        b = params[2 * i + 1].reshape(1, -1).astype(jnp.float32)
        w_packed = w_packed.at[i, : w.shape[0], : w.shape[1]].set(w)
        b_packed = b_packed.at[i, :, : b.shape[1]].set(b)
    return w_packed, b_packed


def model_forward(x, params, *, tile_b=1024):
    """Runs the whole MLP + LogSoftmax as a single batch-tiled Pallas kernel."""
    num_layers = len(params) // 2
    obs_size = params[0].shape[0]
    act_size = params[-1].shape[-1]

    # One common lane-dense padded width for the weight pack (128 here).
    dims = [obs_size] + [params[2 * i].shape[1] for i in range(num_layers)]
    pad = max(_round_up(d, 128) for d in dims)
    obs_pad = _round_up(obs_size, 8)          # input lane width (no 128 padding)

    w_packed, b_packed = pack_params(params, pad)

    # --- batch tiling: big tiles, multiple of 8, and >= 2 grid steps when
    #     possible so v7x's second TensorCore is used (parallel axis). ---
    batch = x.shape[0]
    b8 = _round_up(batch, 8)
    tile_b = max(8, (min(tile_b, b8) // 8) * 8)
    if b8 // tile_b < 2 and b8 >= 16:
        tile_b = _round_up((b8 + 1) // 2, 8)
    padded_batch = _round_up(batch, tile_b)

    x_p = x.astype(jnp.float32)
    if padded_batch != batch or obs_pad != obs_size:
        x_p = jnp.pad(x_p, ((0, padded_batch - batch), (0, obs_pad - obs_size)))

    grid = (padded_batch // tile_b,)
    kernel = make_mlp_kernel(num_layers, obs_pad, act_size, pad)

    # Advisory cost estimate so XLA schedules the custom call sensibly.
    cost = pl.CostEstimate(
        flops=2 * padded_batch * (obs_pad * pad + (num_layers - 1) * pad * pad),
        transcendentals=padded_batch * (pad + 1),
        bytes_accessed=(4 * x_p.size + 2 * w_packed.size + 4 * b_packed.size
                        + 4 * padded_batch * act_size),
    )

    out = pl.pallas_call(
        kernel,
        out_shape=jax.ShapeDtypeStruct((padded_batch, act_size), jnp.float32),
        grid=grid,
        in_specs=[
            pl.BlockSpec((tile_b, obs_pad), lambda i: (i, 0)),              # x tile
            pl.BlockSpec((num_layers, pad, pad), lambda i: (0, 0, 0)),      # resident W
            pl.BlockSpec((num_layers, 1, pad), lambda i: (0, 0, 0)),        # resident b
        ],
        out_specs=pl.BlockSpec((tile_b, act_size), lambda i: (i, 0)),       # lane-tight out
        compiler_params=pltpu.CompilerParams(
            dimension_semantics=("parallel",)),
        cost_estimate=cost,
    )(x_p, w_packed, b_packed)

    if padded_batch != batch:
        out = out[:batch]
    return out.astype(x.dtype)


def reference_forward(x, params):
    """Pure-JAX reference matching the kernel math (bf16 weights/inputs on the
    MXU, f32 accumulation and elementwise, ReLU after every Linear, then
    log-softmax)."""
    h = x.astype(jnp.float32)
    for i in range(len(params) // 2):
        w = params[2 * i].astype(jnp.bfloat16)
        b = params[2 * i + 1].astype(jnp.float32)
        h = jnp.dot(h.astype(jnp.bfloat16), w, preferred_element_type=jnp.float32)
        h = jnp.maximum(h + b, 0.0)
    return jax.nn.log_softmax(h, axis=1)


if __name__ == "__main__":
    # Small shapes consistent with the module's forward.
    linear_num = 2      # number of extra hidden layers
    hidden_size = 32
    obs_size = 16
    act_size = 8
    batch = 64          # gives a 2-step grid (both v7x TensorCores get work)

    key = jax.random.PRNGKey(0)
    key, kx = jax.random.split(key)
    x = jax.random.normal(kx, (batch, obs_size), jnp.float32)

    params = init_params(key, linear_num, hidden_size, obs_size, act_size)
    # logstd parameter exists in the module but is unused in forward():
    logstd = jnp.zeros((act_size,), jnp.float32)  # noqa: F841

    out = model_forward(x, params)
    out = jax.block_until_ready(out)

    ref = reference_forward(x, params)
    assert out.shape == (batch, act_size)
    assert jnp.allclose(out, ref, atol=1e-4, rtol=1e-4), "mismatch vs JAX reference"

    print("KERNEL_OK")
</pallas_src>

<mosaic_0001>
module attributes {stable_mosaic.version = 11 : i64} {
  func.func @kernel(%arg0: i32, %arg1: memref<32x16xf32, #tpu.memory_space<vmem>>, %arg2: memref<4x128x128xbf16, #tpu.memory_space<vmem>>, %arg3: memref<4x1x128xf32, #tpu.memory_space<vmem>>, %arg4: memref<32x8xf32, #tpu.memory_space<vmem>>) attributes {dimension_semantics = [#tpu.dimension_semantics<parallel>], iteration_bounds = array<i64: 2>, scalar_prefetch = 0 : i64, scratch_operands = 0 : i64, tpu.core_type = #tpu.core_type<tc>, window_params = [{transform_indices = @transform_0, window_bounds = array<i64: 32, 16>}, {pipeline_mode = #tpu.pipeline_mode<synchronous>, transform_indices = @transform_1, window_bounds = array<i64: 4, 128, 128>}, {pipeline_mode = #tpu.pipeline_mode<synchronous>, transform_indices = @transform_2, window_bounds = array<i64: 4, 1, 128>}, {transform_indices = @transform_3, window_bounds = array<i64: 32, 8>}]} {
    %c0 = arith.constant 0 : index
    %c0_0 = arith.constant 0 : index
    %0 = vector.load %arg1[%c0, %c0_0] : memref<32x16xf32, #tpu.memory_space<vmem>>, vector<32x16xf32>
    %1 = arith.truncf %0 : vector<32x16xf32> to vector<32x16xbf16>
    %c0_1 = arith.constant 0 : index
    %c0_2 = arith.constant 0 : index
    %c0_3 = arith.constant 0 : index
    %2 = vector.load %arg2[%c0_1, %c0_2, %c0_3] : memref<4x128x128xbf16, #tpu.memory_space<vmem>>, vector<1x16x128xbf16>
    %3 = vector.shape_cast %2 : vector<1x16x128xbf16> to vector<16x128xbf16>
    %cst = arith.constant dense<0.000000e+00> : vector<32x128xf32>
    %4 = tpu.matmul %1, %3, %cst {dimension_numbers = #tpu.dot_dimension_numbers<[1], [0], [0], [1], [0, 0, 1, 1], [], []>} : vector<32x16xbf16>, vector<16x128xbf16>, vector<32x128xf32> -> vector<32x128xf32>
    %c0_4 = arith.constant 0 : index
    %c0_5 = arith.constant 0 : index
    %c0_6 = arith.constant 0 : index
    %5 = vector.load %arg3[%c0_4, %c0_5, %c0_6] : memref<4x1x128xf32, #tpu.memory_space<vmem>>, vector<1x1x128xf32>
    %6 = vector.shape_cast %5 : vector<1x1x128xf32> to vector<1x128xf32>
    %7 = vector.broadcast %6 : vector<1x128xf32> to vector<32x128xf32>
    %8 = arith.addf %4, %7 : vector<32x128xf32>
    %cst_7 = arith.constant 0.000000e+00 : f32
    %9 = vector.broadcast %cst_7 : f32 to vector<32x128xf32>
    %10 = arith.maximumf %8, %9 : vector<32x128xf32>
    %11 = arith.truncf %10 : vector<32x128xf32> to vector<32x128xbf16>
    %c1 = arith.constant 1 : index
    %c0_8 = arith.constant 0 : index
    %c0_9 = arith.constant 0 : index
    %12 = vector.load %arg2[%c1, %c0_8, %c0_9] : memref<4x128x128xbf16, #tpu.memory_space<vmem>>, vector<1x128x128xbf16>
    %13 = vector.shape_cast %12 : vector<1x128x128xbf16> to vector<128x128xbf16>
    %cst_10 = arith.constant dense<0.000000e+00> : vector<32x128xf32>
    %14 = tpu.matmul %11, %13, %cst_10 {dimension_numbers = #tpu.dot_dimension_numbers<[1], [0], [0], [1], [0, 0, 1, 1], [], []>} : vector<32x128xbf16>, vector<128x128xbf16>, vector<32x128xf32> -> vector<32x128xf32>
    %c1_11 = arith.constant 1 : index
    %c0_12 = arith.constant 0 : index
    %c0_13 = arith.constant 0 : index
    %15 = vector.load %arg3[%c1_11, %c0_12, %c0_13] : memref<4x1x128xf32, #tpu.memory_space<vmem>>, vector<1x1x128xf32>
    %16 = vector.shape_cast %15 : vector<1x1x128xf32> to vector<1x128xf32>
    %17 = vector.broadcast %16 : vector<1x128xf32> to vector<32x128xf32>
    %18 = arith.addf %14, %17 : vector<32x128xf32>
    %cst_14 = arith.constant 0.000000e+00 : f32
    %19 = vector.broadcast %cst_14 : f32 to vector<32x128xf32>
    %20 = arith.maximumf %18, %19 : vector<32x128xf32>
    %21 = arith.truncf %20 : vector<32x128xf32> to vector<32x128xbf16>
    %c2 = arith.constant 2 : index
    %c0_15 = arith.constant 0 : index
    %c0_16 = arith.constant 0 : index
    %22 = vector.load %arg2[%c2, %c0_15, %c0_16] : memref<4x128x128xbf16, #tpu.memory_space<vmem>>, vector<1x128x128xbf16>
    %23 = vector.shape_cast %22 : vector<1x128x128xbf16> to vector<128x128xbf16>
    %cst_17 = arith.constant dense<0.000000e+00> : vector<32x128xf32>
    %24 = tpu.matmul %21, %23, %cst_17 {dimension_numbers = #tpu.dot_dimension_numbers<[1], [0], [0], [1], [0, 0, 1, 1], [], []>} : vector<32x128xbf16>, vector<128x128xbf16>, vector<32x128xf32> -> vector<32x128xf32>
    %c2_18 = arith.constant 2 : index
    %c0_19 = arith.constant 0 : index
    %c0_20 = arith.constant 0 : index
    %25 = vector.load %arg3[%c2_18, %c0_19, %c0_20] : memref<4x1x128xf32, #tpu.memory_space<vmem>>, vector<1x1x128xf32>
    %26 = vector.shape_cast %25 : vector<1x1x128xf32> to vector<1x128xf32>
    %27 = vector.broadcast %26 : vector<1x128xf32> to vector<32x128xf32>
    %28 = arith.addf %24, %27 : vector<32x128xf32>
    %cst_21 = arith.constant 0.000000e+00 : f32
    %29 = vector.broadcast %cst_21 : f32 to vector<32x128xf32>
    %30 = arith.maximumf %28, %29 : vector<32x128xf32>
    %31 = arith.truncf %30 : vector<32x128xf32> to vector<32x128xbf16>
    %c3 = arith.constant 3 : index
    %c0_22 = arith.constant 0 : index
    %c0_23 = arith.constant 0 : index
    %32 = vector.load %arg2[%c3, %c0_22, %c0_23] : memref<4x128x128xbf16, #tpu.memory_space<vmem>>, vector<1x128x128xbf16>
    %33 = vector.shape_cast %32 : vector<1x128x128xbf16> to vector<128x128xbf16>
    %cst_24 = arith.constant dense<0.000000e+00> : vector<32x128xf32>
    %34 = tpu.matmul %31, %33, %cst_24 {dimension_numbers = #tpu.dot_dimension_numbers<[1], [0], [0], [1], [0, 0, 1, 1], [], []>} : vector<32x128xbf16>, vector<128x128xbf16>, vector<32x128xf32> -> vector<32x128xf32>
    %c3_25 = arith.constant 3 : index
    %c0_26 = arith.constant 0 : index
    %c0_27 = arith.constant 0 : index
    %35 = vector.load %arg3[%c3_25, %c0_26, %c0_27] : memref<4x1x128xf32, #tpu.memory_space<vmem>>, vector<1x1x128xf32>
    %36 = vector.shape_cast %35 : vector<1x1x128xf32> to vector<1x128xf32>
    %37 = vector.broadcast %36 : vector<1x128xf32> to vector<32x128xf32>
    %38 = arith.addf %34, %37 : vector<32x128xf32>
    %cst_28 = arith.constant 0.000000e+00 : f32
    %39 = vector.broadcast %cst_28 : f32 to vector<32x128xf32>
    %40 = arith.maximumf %38, %39 : vector<32x128xf32>
    %41 = tpu.iota {dimensions = array<i32: 1>} : vector<1x128xi32>
    %c8_i32 = arith.constant 8 : i32
    %42 = vector.broadcast %c8_i32 : i32 to vector<1x128xi32>
    %43 = arith.cmpi slt, %41, %42 : vector<1x128xi32>
    %cst_29 = arith.constant -1.000000e+30 : f32
    %44 = vector.shape_cast %43 : vector<1x128xi1> to vector<1x128xi1>
    %45 = vector.broadcast %44 : vector<1x128xi1> to vector<32x128xi1>
    %46 = vector.broadcast %cst_29 : f32 to vector<32x128xf32>
    %47 = arith.select %45, %40, %46 : vector<32x128xi1>, vector<32x128xf32>
    %cst_30 = arith.constant dense<0xFF800000> : vector<32xf32>
    %48 = vector.multi_reduction <maximumf>, %47, %cst_30 [1] : vector<32x128xf32> to vector<32xf32>
    %49 = vector.shape_cast %48 : vector<32xf32> to vector<32x1xf32>
    %50 = vector.broadcast %49 : vector<32x1xf32> to vector<32x128xf32>
    %51 = arith.subf %47, %50 : vector<32x128xf32>
    %52 = math.exp %51 : vector<32x128xf32>
    %cst_31 = arith.constant dense<0.000000e+00> : vector<32xf32>
    %53 = vector.multi_reduction <add>, %52, %cst_31 [1] : vector<32x128xf32> to vector<32xf32>
    %54 = vector.shape_cast %53 : vector<32xf32> to vector<32x1xf32>
    %55 = math.log %54 : vector<32x1xf32>
    %56 = arith.addf %49, %55 : vector<32x1xf32>
    %57 = vector.broadcast %56 : vector<32x1xf32> to vector<32x128xf32>
    %58 = arith.subf %40, %57 : vector<32x128xf32>
    %59 = vector.extract_strided_slice %58 {offsets = [0, 0], sizes = [32, 8], strides = [1, 1]} : vector<32x128xf32> to vector<32x8xf32>
    %c0_32 = arith.constant 0 : index
    %c0_33 = arith.constant 0 : index
    %60 = vector.load %arg4[%c0_32, %c0_33] : memref<32x8xf32, #tpu.memory_space<vmem>>, vector<32x8xf32>
    tpu.vector_store %arg4[%c0_32, %c0_33], %59 {strides = array<i32>} : memref<32x8xf32, #tpu.memory_space<vmem>>, vector<32x8xf32>,
    return
  }
  func.func @transform_0(%arg0: i32) -> (i32, i32) {
    %c0_i32 = arith.constant 0 : i32
    %c0_i32_0 = arith.constant 0 : i32
    return %arg0, %c0_i32 : i32, i32
  }
  func.func @transform_1(%arg0: i32) -> (i32, i32, i32) {
    %c0_i32 = arith.constant 0 : i32
    %c0_i32_0 = arith.constant 0 : i32
    %c0_i32_1 = arith.constant 0 : i32
    %c0_i32_2 = arith.constant 0 : i32
    return %c0_i32, %c0_i32_0, %c0_i32_1 : i32, i32, i32
  }
  func.func @transform_2(%arg0: i32) -> (i32, i32, i32) {
    %c0_i32 = arith.constant 0 : i32
    %c0_i32_0 = arith.constant 0 : i32
    %c0_i32_1 = arith.constant 0 : i32
    %c0_i32_2 = arith.constant 0 : i32
    return %c0_i32, %c0_i32_0, %c0_i32_1 : i32, i32, i32
  }
  func.func @transform_3(%arg0: i32) -> (i32, i32) {
    %c0_i32 = arith.constant 0 : i32
    %c0_i32_0 = arith.constant 0 : i32
    return %arg0, %c0_i32 : i32, i32
  }
}

</mosaic_0001>

<bundles_post_ra>
// kernel: tpu_custom_call.1
= control target key start
LH: loop header
LB: loop body
LE: loop exit
PB: predicated region body
PF: predicated region fallthrough
CT: control target
= control target key end

     0   :  { %8 = vsyncpa [#allocation3], 0  ;;  %s1050_s12 = smov 0   ;;  %s1125_s0 = inlined_call_operand.vmem [shape: f32[64,16], index: 0, kind: input, shape index: {}]   ;;  %s1126_s1 = inlined_call_operand.hbm [shape: bf16[4,128,128], index: 1, kind: input, shape index: {}]   ;;  %s1127_s2 = inlined_call_operand.vmem [shape: f32[4,1,128], index: 2, kind: input, shape index: {}]   ;;  %s1128_s3 = inlined_call_operand.vmem [shape: f32[64,8], index: 3, kind: output, shape index: {}]  }
   0x1 LB: > { %s781_s13 = sadd.s32 4294967295, %s1025_s12   ;;  %p783_p0 = scmp.ge.s32.totalorder %s1025_s12, 1  ;;  %s1025_s12 = sphi %s1050_s12, %s14_s12  }
   0x2   : > { %p113_p1 = scmp.lt.s32.totalorder %s1025_s12, 3  ;;  %s1027_s14 = smov [#allocation2]  }
   0x3   : > { %s125_s15 = sshll.u32 %s1027_s14, 4  ;;  %p1062_p3 = scmp.eq.s32.totalorder %s781_s13, 0  ;;  %s126_s15 = int_to_ptr.vmem [resolvable:$true] %s125_s15 }
   0x4   : > { %p1058_p2 = pnand %p783_p0, %p113_p1  ;;  %s1000_s18 = scalar_lea.vmem %s126_s15, 4096 }
   0x5   : > { %p1001_p7 = scmp.ne.s32.totalorder %s126_s15, %s1000_s18  ;;  %p1008_p10 = scmp.lt.s32.totalorder %s126_s15, %s126_s15 }
   0x6   : > { %p931_p4 = pneg %p1058_p2  ;;  %p1009_p11 = scmp.lt.s32.totalorder %s1000_s18, %s1000_s18 }
   0x8   : > { %p932_p5 = pnand %p1062_p3, %p931_p4  ;;  %p1010_p12 = por %p1009_p11, %p1008_p10 }
   0xa   : > { %p991_p6 = pneg %p932_p5 }
   0xc   : > { %p1003_p8 = pnand %p1001_p7, %p991_p6 }
   0xe   : > { %p1004_p9 = pneg %p1003_p8 }
  0x10   : > { %p1011_p13 = pnand %p1010_p12, %p1004_p9 }
  0x12   : > { %1014 = shalt.err (!%p1011_p13)
}
  0x13   : > { %s1028_s19 = smov 64   ;;  %s1029_s20 = smov 4  }
  0x14   : > { %934 = dma.hbm_to_vmem [thread:$0]  (!%p932_p5), %s1126_s1, 4096, %s126_s15, [#allocation3], %s1028_s19, %s1028_s19, %s1029_s20  }
  0x15   : > { %153 = sbr.rel (%p1058_p2) target bundleno = 1178 (0x49a), region = 32 }
  0x1a   : > { %1020 = dma.done.wait (%p1062_p3), [#allocation3], 4096  }
  0x1b   : > { %1022 = vsyncadd (%p1062_p3), [#allocation3], 4294963200  ;;  %s788_s23 = sshll.u32 %s781_s13, 2  ;;  %v948_v0 = vld [vmem:[#allocation2] sm:$0xff]   ;;  %vm211_vm0 = vcmask 130048   ;;  %v949_v7 = vld [vmem:[#allocation2 + $0x78] sm:$0xff]  }
  0x1c   : > { %p178_p0 = scmp.lt.s32.totalorder %s788_s23, 7  ;;  %861 = vmatprep.subr.bf16.mxu0 %v948_v0  ;;  %v950_v8 = vld [vmem:[#allocation2 + $0x70] sm:$0xff]   ;;  %867 = vmatprep.subr.bf16.mxu1 %v949_v7  ;;  %v951_v9 = vld [vmem:[#allocation2 + $0x68] sm:$0xff]   ;;  %v952_v10 = vld [vmem:[#allocation2 + $0x60] sm:$0xff]   ;;  %vm708_vm2 = vcmask 64512  }
  0x1d   : > { %862 = vmatpush3.bf16.msra.mxu0 %v948_v0  ;;  %868 = vmatpush3.bf16.msra.mxu1 %v949_v7  ;;  %v953_v11 = vld [vmem:[#allocation2 + $0x58] sm:$0xff]   ;;  %v954_v12 = vld [vmem:[#allocation2 + $0x50] sm:$0xff]   ;;  %v955_v13 = vld [vmem:[#allocation2 + $0x48] sm:$0xff]  }
  0x1e   : > { %s1132_s23 = smov (!%p178_p0, %s788_s23), 7  ;;  %869 = vmatprep.subr.bf16.mxu1 %v950_v8  ;;  %v956_v14 = vld [vmem:[#allocation2 + $0x40] sm:$0xff]   ;;  %v957_v15 = vld [vmem:[#allocation2 + $0xb8] sm:$0xff]   ;;  %v958_v16 = vld [vmem:[#allocation2 + $0xb0] sm:$0xff]  }
  0x1f   : > { %s789_s24 = sshll.u32 %s1132_s23, 3  ;;  %887 = vmatprep.subr.bf16.mxu0 %v957_v15  ;;  %v959_v17 = vld [vmem:[#allocation2 + $0xa8] sm:$0xff]   ;;  %v960_v18 = vld [vmem:[#allocation2 + $0xa0] sm:$0xff]   ;;  %v961_v19 = vld [vmem:[#allocation2 + $0x98] sm:$0xff]  }
  0x20   : > { %s181_s27 = scalar_lea.vmem %s1125_s0, %s789_s24  ;;  %v792_v22 = vld [vmem:[%s1127_s2] ss:$0 sm:$0xff]  ;;  %v962_v35 = vld [vmem:[#allocation2 + $0x90] sm:$0xff]   ;;  %v963_v36 = vld [vmem:[#allocation2 + $0x88] sm:$0xff]   ;;  %s187_s11 = scalar_lea.vmem %s1128_s3, %s789_s24 }
  0x21   : > { %v190_v1 = vld [vmem:[%s181_s27] sm:$0xff]  ;;  %v191_v2 = vld [vmem:[%s181_s27 + $0x8] sm:$0xff]  ;;  %v192_v3 = vld [vmem:[%s181_s27 + $0x10] sm:$0xff]  ;;  %870 = vmatpush3.bf16.msra.mxu1 %v950_v8 }
  0x22   : > { %v194_v4 = vpack.c.bf16 %v191_v2, %v190_v1  ;;  %v193_v5 = vld [vmem:[%s181_s27 + $0x18] sm:$0xff]  ;;  %871 = vmatprep.subr.bf16.mxu1 %v951_v9  ;;  %v964_v37 = vld [vmem:[#allocation2 + $0x80] sm:$0xff]   ;;  %v966_v39 = vld [vmem:[#allocation2 + $0xf0] sm:$0xff]  }
  0x23   : > { %v195_v6 = vpack.c.bf16 %v193_v5, %v192_v3  ;;  %v965_v38 = vld [vmem:[#allocation2 + $0xf8] sm:$0xff]   ;;  %v967_v40 = vld [vmem:[#allocation2 + $0xe8] sm:$0xff]   ;;  %v968_v41 = vld [vmem:[#allocation2 + $0xe0] sm:$0xff]  }
  0x24   : > { %863 = vmatprep.mubr.msk.bf16.mxu0 %vm211_vm0, %v194_v4  ;;  %v969_v42 = vld [vmem:[#allocation2 + $0xd8] sm:$0xff]   ;;  %v797_v45 = vld [vmem:[%s1127_s2 + $0x1] ss:$0 sm:$0xff]  ;;  %v970_v58 = vld [vmem:[#allocation2 + $0xd0] sm:$0xff]  }
  0x25   : > { %864 = vmatmul.mubr.msk.bf16.vlgmr.msra.gmra.mxu0 %vm211_vm0, %v195_v6  ;;  %872 = vmatpush3.bf16.msra.mxu1 %v951_v9  ;;  %v971_v59 = vld [vmem:[#allocation2 + $0xc8] sm:$0xff]   ;;  %v972_v60 = vld [vmem:[#allocation2 + $0xc0] sm:$0xff]  }
  0x26   : > { %873 = vmatprep.subr.bf16.mxu1 %v952_v10  ;;  %888 = vmatpush3.bf16.msra.mxu0 %v957_v15  ;;  %v807_v63 = vld [vmem:[%s1127_s2 + $0x2] ss:$0 sm:$0xff] }
  0x27   : > { %889 = vmatprep.subr.bf16.mxu0 %v958_v16 }
  0x29   : > { %874 = vmatpush3.bf16.msra.mxu1 %v952_v10 }
  0x2a   : > { %875 = vmatprep.subr.bf16.mxu1 %v953_v11  ;;  %890 = vmatpush3.bf16.msra.mxu0 %v958_v16 }
  0x2b   : > { %891 = vmatprep.subr.bf16.mxu0 %v959_v17 }
  0x2d   : > { %876 = vmatpush3.bf16.msra.mxu1 %v953_v11 }
  0x2e   : > { %877 = vmatprep.subr.bf16.mxu1 %v954_v12  ;;  %892 = vmatpush3.bf16.msra.mxu0 %v959_v17 }
  0x2f   : > { %893 = vmatprep.subr.bf16.mxu0 %v960_v18 }
  0x31   : > { %878 = vmatpush3.bf16.msra.mxu1 %v954_v12  ;;  %v655_v12 = vlaneseq }
  0x32   : > { %879 = vmatprep.subr.bf16.mxu1 %v955_v13  ;;  %894 = vmatpush3.bf16.msra.mxu0 %v960_v18 }
  0x33   : > { %895 = vmatprep.subr.bf16.mxu0 %v961_v19 }
  0x35   : > { %880 = vmatpush3.bf16.msra.mxu1 %v955_v13  ;;  %v817_v13 = vld [vmem:[%s1127_s2 + $0x3] ss:$0 sm:$0xff] }
  0x36   : > { %881 = vmatprep.subr.bf16.mxu1 %v956_v14  ;;  %896 = vmatpush3.bf16.msra.mxu0 %v961_v19 }
  0x37   : > { %897 = vmatprep.subr.bf16.mxu0 %v962_v35 }
  0x39   : > { %882 = vmatpush3.bf16.msra.mxu1 %v956_v14  ;;  %v656_v14 = vand.u32 127, %v655_v12 }
  0x3a   : > { %898 = vmatpush3.bf16.msra.mxu0 %v962_v35  ;;  %907 = vmatprep.subr.bf16.mxu1 %v965_v38 }
  0x3b   : > { %899 = vmatprep.subr.bf16.mxu0 %v963_v36  ;;  %vm657_vm1 = vcmp.lt.s32.totalorder %v656_v14, 8 }
  0x3e   : > { %900 = vmatpush3.bf16.msra.mxu0 %v963_v36 }
  0x3f   : > { %901 = vmatprep.subr.bf16.mxu0 %v964_v37 }
  0x42   : > { %902 = vmatpush3.bf16.msra.mxu0 %v964_v37 }
  0xe5   : > { %v865_v20 = vpop.f32.mrf.mxu0 }
  0xe6   : > { %v261_v26 = vadd.f32 %v865_v20, %v792_v22 }
  0xe7   : > { %v252_v21 = vpop.f32.mrf.mxu0 }
  0xe8   : > { %v253_v24 = vadd.f32 %v792_v22, %v252_v21  ;;  %v269_v32 = vmax.f32 %v261_v26, 0.0 }
  0xe9   : > { %v866_v23 = vpop.f32.mrf.mxu0 }
  0xea   : > { %v264_v25 = vadd.f32 %v866_v23, %v792_v22  ;;  %v267_v30 = vmax.f32 %v253_v24, 0.0 }
  0xeb   : > { %v255_v27 = vpop.f32.mrf.mxu0 }
  0xec   : > { %v256_v28 = vadd.f32 %v792_v22, %v255_v27  ;;  %v270_v29 = vmax.f32 %v264_v25, 0.0 }
  0xee   : > { %v268_v31 = vmax.f32 %v256_v28, 0.0  ;;  %v272_v34 = vpack.c.bf16 %v270_v29, %v269_v32 }
  0xf0   : > { %v271_v33 = vpack.c.bf16 %v268_v31, %v267_v30 }
  0xf2   : > { %883 = vmatprep.mubr.bf16.mxu1 %v271_v33 }
  0xf3   : > { %884 = vmatmul.mubr.bf16.vlgmr.msra.gmra.mxu1 %v272_v34 }
  0xf4   : > { %908 = vmatpush3.bf16.msra.mxu1 %v965_v38 }
  0xf5   : > { %909 = vmatprep.subr.bf16.mxu1 %v966_v39 }
  0xf8   : > { %910 = vmatpush3.bf16.msra.mxu1 %v966_v39 }
  0xf9   : > { %911 = vmatprep.subr.bf16.mxu1 %v967_v40 }
  0xfc   : > { %912 = vmatpush3.bf16.msra.mxu1 %v967_v40 }
  0xfd   : > { %913 = vmatprep.subr.bf16.mxu1 %v968_v41 }
 0x100   : > { %914 = vmatpush3.bf16.msra.mxu1 %v968_v41 }
 0x101   : > { %915 = vmatprep.subr.bf16.mxu1 %v969_v42 }
 0x104   : > { %916 = vmatpush3.bf16.msra.mxu1 %v969_v42 }
 0x105   : > { %917 = vmatprep.subr.bf16.mxu1 %v970_v58 }
 0x108   : > { %918 = vmatpush3.bf16.msra.mxu1 %v970_v58 }
 0x109   : > { %919 = vmatprep.subr.bf16.mxu1 %v971_v59 }
 0x10c   : > { %920 = vmatpush3.bf16.msra.mxu1 %v971_v59 }
 0x10d   : > { %921 = vmatprep.subr.bf16.mxu1 %v972_v60 }
 0x110   : > { %922 = vmatpush3.bf16.msra.mxu1 %v972_v60 }
 0x1b3   : > { %v885_v43 = vpop.f32.mrf.mxu1 }
 0x1b4   : > { %v389_v49 = vadd.f32 %v885_v43, %v797_v45 }
 0x1b5   : > { %v380_v44 = vpop.f32.mrf.mxu1 }
 0x1b6   : > { %v381_v47 = vadd.f32 %v797_v45, %v380_v44  ;;  %v397_v55 = vmax.f32 %v389_v49, 0.0 }
 0x1b7   : > { %v886_v46 = vpop.f32.mrf.mxu1 }
 0x1b8   : > { %v392_v48 = vadd.f32 %v886_v46, %v797_v45  ;;  %v395_v53 = vmax.f32 %v381_v47, 0.0 }
 0x1b9   : > { %v383_v50 = vpop.f32.mrf.mxu1 }
 0x1ba   : > { %v384_v51 = vadd.f32 %v797_v45, %v383_v50  ;;  %v398_v52 = vmax.f32 %v392_v48, 0.0 }
 0x1bc   : > { %v396_v54 = vmax.f32 %v384_v51, 0.0  ;;  %v400_v57 = vpack.c.bf16 %v398_v52, %v397_v55 }
 0x1be   : > { %v399_v56 = vpack.c.bf16 %v396_v54, %v395_v53 }
 0x1c0   : > { %903 = vmatprep.mubr.bf16.mxu0 %v399_v56 }
 0x1c1   : > { %904 = vmatmul.mubr.bf16.vlgmr.msra.gmra.mxu0 %v400_v57 }
 0x281   : > { %v905_v61 = vpop.f32.mrf.mxu0 }
 0x282   : > { %v517_v3 = vadd.f32 %v905_v61, %v807_v63 }
 0x283   : > { %v508_v62 = vpop.f32.mrf.mxu0 }
 0x284   : > { %v509_v1 = vadd.f32 %v807_v63, %v508_v62  ;;  %v525_v9 = vmax.f32 %v517_v3, 0.0 }
 0x285   : > { %v906_v0 = vpop.f32.mrf.mxu0 }
 0x286   : > { %v520_v2 = vadd.f32 %v906_v0, %v807_v63  ;;  %v523_v7 = vmax.f32 %v509_v1, 0.0 }
 0x287   : > { %v511_v4 = vpop.f32.mrf.mxu0 }
 0x288   : > { %v512_v5 = vadd.f32 %v807_v63, %v511_v4  ;;  %v526_v6 = vmax.f32 %v520_v2, 0.0 }
 0x28a   : > { %v524_v8 = vmax.f32 %v512_v5, 0.0  ;;  %v528_v11 = vpack.c.bf16 %v526_v6, %v525_v9 }
 0x28c   : > { %v527_v10 = vpack.c.bf16 %v524_v8, %v523_v7 }
 0x28e   : > { %923 = vmatprep.mubr.bf16.mxu1 %v527_v10 }
 0x28f   : > { %924 = vmatmul.mubr.bf16.vlgmr.msra.gmra.mxu1 %v528_v11 }
 0x34f   : > { %v925_v15 = vpop.f32.mrf.mxu1 }
 0x350   : > { %v1099_v16 = vadd.f32 %v925_v15, %v817_v13 }
 0x351   : > { %v636_v17 = vpop.f32.mrf.mxu1 }
 0x352   : > { %v653_v18 = vmax.f32 %v1099_v16, 0.0  ;;  %v637_v19 = vadd.f32 %v817_v13, %v636_v17 }
 0x353   : > { %v926_v20 = vpop.f32.mrf.mxu1 }
 0x354   : > { %v651_v21 = vmax.f32 %v637_v19, 0.0  ;;  %v1102_v22 = vadd.f32 %v926_v20, %v817_v13  ;;  %v662_v23 = vsel %vm657_vm1, %v653_v18, -1e+30 }
 0x355   : > { %668 = vmax.xlane.f32.xlu1 %v662_v23  ;;  %v639_v24 = vpop.f32.mrf.mxu1 }
 0x356   : > { %v654_v25 = vmax.f32 %v1102_v22, 0.0  ;;  %v640_v26 = vadd.f32 %v817_v13, %v639_v24  ;;  %v660_v27 = vsel %vm657_vm1, %v651_v21, -1e+30 }
 0x357   : > { %664 = vmax.xlane.f32.xlu0 %v660_v27 }
 0x358   : > { %v652_v28 = vmax.f32 %v640_v26, 0.0  ;;  %v663_v29 = vsel %vm657_vm1, %v654_v25, -1e+30 }
 0x359   : > { %670 = vmax.xlane.f32.xlu1 %v663_v29 }
 0x35a   : > { %v661_v30 = vsel %vm657_vm1, %v652_v28, -1e+30 }
 0x35b   : > { %666 = vmax.xlane.f32.xlu0 %v661_v30 }
 0x3de   : > { %v669_v31 = vpop.xlane.xlu1 %668 }
 0x3df   : > { %v674_v32 = vsub.f32 %v662_v23, %v669_v31 }
 0x3e0   : > { %v665_v33 = vpop.xlane.xlu0 %664 }
 0x3e1   : > { %v672_v34 = vsub.f32 %v660_v27, %v665_v33  ;;  %v680_v37 = vmul.f32 1.442695, %v674_v32 }
 0x3e2   : > { %v671_v35 = vpop.xlane.xlu1 %670 }
 0x3e3   : > { %v676_v36 = vmul.f32 1.442695, %v672_v34  ;;  %v675_v39 = vsub.f32 %v663_v29, %v671_v35 }
 0x3e4   : > { %v667_v38 = vpop.xlane.xlu0 %666 }
 0x3e5   : > { %973 = vpow2.f32 %v676_v36  ;;  %v673_v40 = vsub.f32 %v661_v30, %v667_v38  ;;  %v682_v42 = vmul.f32 1.442695, %v675_v39 }
 0x3e6   : > { %975 = vpow2.f32 %v680_v37 }
 0x3e7   : > { %v678_v41 = vmul.f32 1.442695, %v673_v40 }
 0x3e9   : > { %977 = vpow2.f32 %v678_v41 }
 0x3ea   : > { %979 = vpow2.f32 %v682_v42 }
 0x3f2   : > { %v974_v43 = vpop.eup %973 }
 0x3f3   : > { %684 = vadd.xlane.f32.xlu0 %v974_v43  ;;  %v976_v44 = vpop.eup %975 }
 0x3f6   : > { %v978_v45 = vpop.eup %977 }
 0x3f7   : > { %688 = vadd.xlane.f32.xlu0 %v976_v44  ;;  %686 = vadd.xlane.f32.xlu1 %v978_v45  ;;  %v980_v46 = vpop.eup %979 }
 0x3fb   : > { %690 = vadd.xlane.f32.xlu1 %v980_v46 }
 0x47c   : > { %v685_v47 = vpop.xlane.xlu0 %684 }
 0x47d   : > { %981 = vlog2.f32 %v685_v47 }
 0x480   : > { %v687_v48 = vpop.xlane.xlu1 %686  ;;  %v689_v49 = vpop.xlane.xlu0 %688 }
 0x481   : > { %983 = vlog2.f32 %v687_v48 }
 0x482   : > { %985 = vlog2.f32 %v689_v49 }
 0x484   : > { %v691_v50 = vpop.xlane.xlu1 %690 }
 0x485   : > { %987 = vlog2.f32 %v691_v50 }
 0x48a   : > { %v982_v51 = vpop.eup %981 }
 0x48b   : > { %v693_v52 = vmul.f32 0.6931472, %v982_v51 }
 0x48d   : > { %v700_v53 = vadd.f32 %v693_v52, %v665_v33 }
 0x48e   : > { %v984_v54 = vpop.eup %983 }
 0x48f   : > { %v986_v55 = vpop.eup %985  ;;  %v704_v56 = vsub.f32 %v651_v21, %v700_v53  ;;  %v695_v57 = vmul.f32 0.6931472, %v984_v54 }
 0x490   : > { %v697_v58 = vmul.f32 0.6931472, %v986_v55 }
 0x491   : > { %709 = vst.msk [vmem:[%s187_s11] sm:$0xff] %vm708_vm2, %v704_v56  ;;  %v701_v59 = vadd.f32 %v695_v57, %v667_v38 }
 0x492   : > { %v988_v60 = vpop.eup %987  ;;  %v702_v61 = vadd.f32 %v697_v58, %v669_v31 }
 0x493   : > { %v705_v62 = vsub.f32 %v652_v28, %v701_v59  ;;  %v699_v63 = vmul.f32 0.6931472, %v988_v60 }
 0x494   : > { %v706_v0 = vsub.f32 %v653_v18, %v702_v61 }
 0x495   : > { %710 = vst.msk [vmem:[%s187_s11 + $0x8] sm:$0xff] %vm708_vm2, %v705_v62  ;;  %v703_v1 = vadd.f32 %v699_v63, %v671_v35 }
 0x496   : > { %711 = vst.msk [vmem:[%s187_s11 + $0x10] sm:$0xff] %vm708_vm2, %v706_v0 }
 0x497   : > { %v707_v2 = vsub.f32 %v654_v25, %v703_v1 }
 0x499   : > { %712 = vst.msk [vmem:[%s187_s11 + $0x18] sm:$0xff] %vm708_vm2, %v707_v2 }
 0x49a PF: > { %s14_s12 = sadd.s32 1, %s1025_s12  }
 0x49b   : > { %p11_p1 = scmp.ge.s32.totalorder %s14_s12, 4  }
 0x49d   :  { %13 = sbr.rel (!%p11_p1) target bundleno = 1 (0x1), region = 73 }
 0x4a2   :  { %735 = vsyncpa [#allocation3], 1 }
 0x4a3   :  { %737 = vsyncpa [#allocation3 + $0x1], 1 }

</bundles_post_ra>
